<compile_context>
chip_gen: v7x
topology: tpu7x:2x2x1
jax: 0.10.0
libtpu: 0.0.40
codegen_flags: <defaults>
</compile_context>

<pallas_src>
import jax
import jax.numpy as jnp
from jax import lax
from jax.experimental import pallas as pl
from jax.experimental.pallas import tpu as pltpu


def make_seb_kernel(tap_offsets, m):
    """tap_offsets: 9 static lane offsets into the halo-extended flat input.
    m: padded spatial size Hp*Wp (output lane extent)."""

    def seb_kernel(xe_ref, x1_ref, w_ref, b_ref, o_ref):
        # xe_ref: (1, Cin, Le)   halo-extended, flattened, zero-padded x2
        # x1_ref: (1, Cout, m)   flattened, zero-padded gating input
        # w_ref : (9, Cout, Cin) BN-folded conv weight, one (Cout,Cin) per tap
        # b_ref : (Cout, 1)      BN-folded bias (f32)
        # o_ref : (1, Cout, m)
        cout = w_ref.shape[1]
        acc = jnp.zeros((cout, m), jnp.float32)
        # 3x3 conv = 9 accumulated matmuls over shifted views of one VMEM tile.
        for t, off in enumerate(tap_offsets):          # static unroll (9 taps)
            acc = acc + jnp.dot(
                w_ref[t], xe_ref[0, :, off:off + m],
                preferred_element_type=jnp.float32)
        acc = acc + b_ref[...]                         # folded BN bias (f32)
        act = jnp.maximum(acc, 0.0)                    # ReLU (f32, VPU)
        # Gating multiply in f32; cast only at the store.
        o_ref[0] = (x1_ref[0].astype(jnp.float32) * act).astype(o_ref.dtype)

    return seb_kernel


def seb_forward(x1, x2, params, compute_dtype=None):
    """x1: [N, Cout, H, W], x2: [N, Cin, H, W]  (NCHW, like PyTorch).

    compute_dtype: optional dtype for the kernel's streamed inputs
    (e.g. jnp.bfloat16 on v6e/v7x); accumulation/epilogue stay in f32.
    """
    w = params["conv_w"]          # [Cout, Cin, 3, 3]  (OIHW, like PyTorch)
    b = params["conv_b"]          # [Cout]
    gamma, beta = params["bn_gamma"], params["bn_beta"]
    rmean, rvar, eps = params["bn_mean"], params["bn_var"], params["bn_eps"]

    N, Cin, H, W = x2.shape
    Cout = w.shape[0]
    Hp, Wp = H + 2, W + 2
    M = Hp * Wp                    # padded spatial (flat) = output lane axis
    halo = Wp + 1                  # max |tap shift| in flat coordinates
    Le = M + 2 * halo              # halo-extended flat input length

    cdt = compute_dtype if compute_dtype is not None else x2.dtype

    # ---- fold BatchNorm (running stats) into conv weight / bias -----------
    scale = gamma / jnp.sqrt(rvar + eps)                       # [Cout]
    w_f = w * scale[:, None, None, None]                       # [Cout,Cin,3,3]
    # wk[t=ky*3+kx, cout, cin] = scale[cout] * w[cout, cin, ky, kx]
    wk = jnp.transpose(w_f, (2, 3, 0, 1)).reshape(9, Cout, Cin).astype(cdt)
    bias = (scale * (b - rmean) + beta).reshape(Cout, 1).astype(jnp.float32)

    # ---- NCHW-native layout plumbing (no transposes, no 9x im2col) --------
    # zero-pad x2 spatially, flatten spatial, then add a flat halo so every
    # 3x3 tap is a static contiguous lane window of length M.
    x2p = jnp.pad(x2, ((0, 0), (0, 0), (1, 1), (1, 1))).reshape(N, Cin, M)
    xe = jnp.pad(x2p, ((0, 0), (0, 0), (halo, halo))).astype(cdt)   # [N,Cin,Le]
    x1p = jnp.pad(x1, ((0, 0), (0, 0), (1, 1), (1, 1))
                  ).reshape(N, Cout, M).astype(cdt)                 # [N,Cout,M]

    # flat offset of tap (ky,kx): (ky-1)*Wp + (kx-1) + halo = ky*Wp + kx
    tap_offsets = [ky * Wp + kx for ky in range(3) for kx in range(3)]

    out_p = pl.pallas_call(
        make_seb_kernel(tap_offsets, M),
        out_shape=jax.ShapeDtypeStruct((N, Cout, M), x1.dtype),
        grid_spec=pltpu.PrefetchScalarGridSpec(
            num_scalar_prefetch=0,
            grid=(N,),
            in_specs=[
                pl.BlockSpec((1, Cin, Le), lambda n: (n, 0, 0)),    # x2 (ext.)
                pl.BlockSpec((1, Cout, M), lambda n: (n, 0, 0)),    # x1 gate
                pl.BlockSpec((9, Cout, Cin), lambda n: (0, 0, 0)),  # weights
                pl.BlockSpec((Cout, 1), lambda n: (0, 0)),          # bias
            ],
            out_specs=pl.BlockSpec((1, Cout, M), lambda n: (n, 0, 0)),
        ),
        compiler_params=pltpu.CompilerParams(
            dimension_semantics=("parallel",),          # shard batch over TCs
            vmem_limit_bytes=64 * 1024 * 1024),
    )(xe, x1p, wk, bias)

    # Drop the padded border (it is gated to exactly 0 by the zero-padded x1).
    return out_p.reshape(N, Cout, Hp, Wp)[:, :, 1:H + 1, 1:W + 1]


def seb_reference(x1, x2, params):
    """Pure-JAX reference (NCHW, matches PyTorch eval-mode semantics)."""
    w, b = params["conv_w"], params["conv_b"]
    conv = lax.conv_general_dilated(
        x2, w, window_strides=(1, 1), padding=((1, 1), (1, 1)),
        dimension_numbers=("NCHW", "OIHW", "NCHW"))
    conv = conv + b[None, :, None, None]
    scale = params["bn_gamma"] / jnp.sqrt(params["bn_var"] + params["bn_eps"])
    bn = (scale[None, :, None, None]
          * (conv - params["bn_mean"][None, :, None, None])
          + params["bn_beta"][None, :, None, None])
    return x1 * jnp.maximum(bn, 0.0)


def seb_reference_lowp(x1, x2, params, compute_dtype):
    """Reference matching the kernel's low-precision input path: BN folded into
    the conv weight, inputs/weights rounded to compute_dtype, f32 math."""
    w, b = params["conv_w"], params["conv_b"]
    scale = params["bn_gamma"] / jnp.sqrt(params["bn_var"] + params["bn_eps"])
    w_f = (w * scale[:, None, None, None]).astype(compute_dtype).astype(jnp.float32)
    bias = scale * (b - params["bn_mean"]) + params["bn_beta"]
    cast = lambda a: a.astype(compute_dtype).astype(jnp.float32)
    conv = lax.conv_general_dilated(
        cast(x2), w_f, window_strides=(1, 1), padding=((1, 1), (1, 1)),
        dimension_numbers=("NCHW", "OIHW", "NCHW"))
    bn = conv + bias[None, :, None, None]
    return (cast(x1) * jnp.maximum(bn, 0.0)).astype(x1.dtype)


def init_params(key, in_channels, out_channels):
    k = jax.random.split(key, 6)
    fan_in = in_channels * 9
    bound = 1.0 / jnp.sqrt(fan_in)
    return {
        "conv_w": jax.random.uniform(k[0], (out_channels, in_channels, 3, 3),
                                     jnp.float32, -bound, bound),
        "conv_b": jax.random.uniform(k[1], (out_channels,), jnp.float32,
                                     -bound, bound),
        "bn_gamma": jax.random.uniform(k[2], (out_channels,), jnp.float32, 0.5, 1.5),
        "bn_beta": 0.1 * jax.random.normal(k[3], (out_channels,), jnp.float32),
        "bn_mean": 0.1 * jax.random.normal(k[4], (out_channels,), jnp.float32),
        "bn_var": jax.random.uniform(k[5], (out_channels,), jnp.float32, 0.5, 1.5),
        "bn_eps": 1e-5,
    }


if __name__ == "__main__":
    N, Cin, Cout, H, W = 2, 4, 8, 16, 16

    key = jax.random.PRNGKey(0)
    k_x1, k_x2, k_p = jax.random.split(key, 3)

    x1 = jax.random.normal(k_x1, (N, Cout, H, W), jnp.float32)  # gating input
    x2 = jax.random.normal(k_x2, (N, Cin, H, W), jnp.float32)   # conv input
    params = init_params(k_p, Cin, Cout)

    # f32 path: parity with PyTorch eval-mode semantics.
    out = jax.block_until_ready(seb_forward(x1, x2, params))
    ref = jax.block_until_ready(seb_reference(x1, x2, params))
    assert out.shape == (N, Cout, H, W)
    assert jnp.allclose(out, ref, rtol=1e-4, atol=1e-4), (
        float(jnp.max(jnp.abs(out - ref))))

    # bf16-input path (halves HBM traffic on v6e/v7x), f32 accumulation.
    out_bf = jax.block_until_ready(
        seb_forward(x1, x2, params, compute_dtype=jnp.bfloat16))
    ref_bf = jax.block_until_ready(
        seb_reference_lowp(x1, x2, params, jnp.bfloat16))
    assert out_bf.shape == (N, Cout, H, W)
    assert jnp.allclose(out_bf, ref_bf, rtol=5e-3, atol=5e-3), (
        float(jnp.max(jnp.abs(out_bf - ref_bf))))

    print("KERNEL_OK")
</pallas_src>

<mosaic_0001>
module attributes {stable_mosaic.version = 11 : i64} {
  func.func @seb_kernel(%arg0: i32, %arg1: memref<1x4x362xf32, #tpu.memory_space<vmem>>, %arg2: memref<1x8x324xf32, #tpu.memory_space<vmem>>, %arg3: memref<9x8x4xf32, #tpu.memory_space<vmem>>, %arg4: memref<8x1xf32, #tpu.memory_space<vmem>>, %arg5: memref<1x8x324xf32, #tpu.memory_space<vmem>>) attributes {dimension_semantics = [#tpu.dimension_semantics<parallel>], iteration_bounds = array<i64: 2>, scalar_prefetch = 0 : i64, scratch_operands = 0 : i64, tpu.core_type = #tpu.core_type<tc>, window_params = [{transform_indices = @transform_0, window_bounds = array<i64: 1, 4, 362>}, {transform_indices = @transform_1, window_bounds = array<i64: 1, 8, 324>}, {pipeline_mode = #tpu.pipeline_mode<synchronous>, transform_indices = @transform_2, window_bounds = array<i64: 9, 8, 4>}, {pipeline_mode = #tpu.pipeline_mode<synchronous>, transform_indices = @transform_3, window_bounds = array<i64: 8, 1>}, {transform_indices = @transform_4, window_bounds = array<i64: 1, 8, 324>}]} {
    %cst = arith.constant 0.000000e+00 : f32
    %0 = vector.broadcast %cst : f32 to vector<8x324xf32>
    %c0 = arith.constant 0 : index
    %c0_0 = arith.constant 0 : index
    %c0_1 = arith.constant 0 : index
    %1 = vector.load %arg3[%c0, %c0_0, %c0_1] : memref<9x8x4xf32, #tpu.memory_space<vmem>>, vector<1x8x4xf32>
    %2 = vector.shape_cast %1 : vector<1x8x4xf32> to vector<8x4xf32>
    %c0_2 = arith.constant 0 : index
    %c0_3 = arith.constant 0 : index
    %c0_4 = arith.constant 0 : index
    %3 = vector.load %arg1[%c0_2, %c0_3, %c0_4] : memref<1x4x362xf32, #tpu.memory_space<vmem>>, vector<1x4x324xf32>
    %4 = vector.shape_cast %3 : vector<1x4x324xf32> to vector<4x324xf32>
    %cst_5 = arith.constant dense<0.000000e+00> : vector<8x324xf32>
    %5 = tpu.matmul %2, %4, %cst_5 {dimension_numbers = #tpu.dot_dimension_numbers<[1], [0], [0], [1], [0, 0, 1, 1], [], []>} : vector<8x4xf32>, vector<4x324xf32>, vector<8x324xf32> -> vector<8x324xf32>
    %6 = arith.addf %0, %5 : vector<8x324xf32>
    %c1 = arith.constant 1 : index
    %c0_6 = arith.constant 0 : index
    %c0_7 = arith.constant 0 : index
    %7 = vector.load %arg3[%c1, %c0_6, %c0_7] : memref<9x8x4xf32, #tpu.memory_space<vmem>>, vector<1x8x4xf32>
    %8 = vector.shape_cast %7 : vector<1x8x4xf32> to vector<8x4xf32>
    %c0_8 = arith.constant 0 : index
    %c0_9 = arith.constant 0 : index
    %c1_10 = arith.constant 1 : index
    %9 = vector.load %arg1[%c0_8, %c0_9, %c1_10] : memref<1x4x362xf32, #tpu.memory_space<vmem>>, vector<1x4x324xf32>
    %10 = vector.shape_cast %9 : vector<1x4x324xf32> to vector<4x324xf32>
    %cst_11 = arith.constant dense<0.000000e+00> : vector<8x324xf32>
    %11 = tpu.matmul %8, %10, %cst_11 {dimension_numbers = #tpu.dot_dimension_numbers<[1], [0], [0], [1], [0, 0, 1, 1], [], []>} : vector<8x4xf32>, vector<4x324xf32>, vector<8x324xf32> -> vector<8x324xf32>
    %12 = arith.addf %6, %11 : vector<8x324xf32>
    %c2 = arith.constant 2 : index
    %c0_12 = arith.constant 0 : index
    %c0_13 = arith.constant 0 : index
    %13 = vector.load %arg3[%c2, %c0_12, %c0_13] : memref<9x8x4xf32, #tpu.memory_space<vmem>>, vector<1x8x4xf32>
    %14 = vector.shape_cast %13 : vector<1x8x4xf32> to vector<8x4xf32>
    %c0_14 = arith.constant 0 : index
    %c0_15 = arith.constant 0 : index
    %c2_16 = arith.constant 2 : index
    %15 = vector.load %arg1[%c0_14, %c0_15, %c2_16] : memref<1x4x362xf32, #tpu.memory_space<vmem>>, vector<1x4x324xf32>
    %16 = vector.shape_cast %15 : vector<1x4x324xf32> to vector<4x324xf32>
    %cst_17 = arith.constant dense<0.000000e+00> : vector<8x324xf32>
    %17 = tpu.matmul %14, %16, %cst_17 {dimension_numbers = #tpu.dot_dimension_numbers<[1], [0], [0], [1], [0, 0, 1, 1], [], []>} : vector<8x4xf32>, vector<4x324xf32>, vector<8x324xf32> -> vector<8x324xf32>
    %18 = arith.addf %12, %17 : vector<8x324xf32>
    %c3 = arith.constant 3 : index
    %c0_18 = arith.constant 0 : index
    %c0_19 = arith.constant 0 : index
    %19 = vector.load %arg3[%c3, %c0_18, %c0_19] : memref<9x8x4xf32, #tpu.memory_space<vmem>>, vector<1x8x4xf32>
    %20 = vector.shape_cast %19 : vector<1x8x4xf32> to vector<8x4xf32>
    %c0_20 = arith.constant 0 : index
    %c0_21 = arith.constant 0 : index
    %c18 = arith.constant 18 : index
    %21 = vector.load %arg1[%c0_20, %c0_21, %c18] : memref<1x4x362xf32, #tpu.memory_space<vmem>>, vector<1x4x324xf32>
    %22 = vector.shape_cast %21 : vector<1x4x324xf32> to vector<4x324xf32>
    %cst_22 = arith.constant dense<0.000000e+00> : vector<8x324xf32>
    %23 = tpu.matmul %20, %22, %cst_22 {dimension_numbers = #tpu.dot_dimension_numbers<[1], [0], [0], [1], [0, 0, 1, 1], [], []>} : vector<8x4xf32>, vector<4x324xf32>, vector<8x324xf32> -> vector<8x324xf32>
    %24 = arith.addf %18, %23 : vector<8x324xf32>
    %c4 = arith.constant 4 : index
    %c0_23 = arith.constant 0 : index
    %c0_24 = arith.constant 0 : index
    %25 = vector.load %arg3[%c4, %c0_23, %c0_24] : memref<9x8x4xf32, #tpu.memory_space<vmem>>, vector<1x8x4xf32>
    %26 = vector.shape_cast %25 : vector<1x8x4xf32> to vector<8x4xf32>
    %c0_25 = arith.constant 0 : index
    %c0_26 = arith.constant 0 : index
    %c19 = arith.constant 19 : index
    %27 = vector.load %arg1[%c0_25, %c0_26, %c19] : memref<1x4x362xf32, #tpu.memory_space<vmem>>, vector<1x4x324xf32>
    %28 = vector.shape_cast %27 : vector<1x4x324xf32> to vector<4x324xf32>
    %cst_27 = arith.constant dense<0.000000e+00> : vector<8x324xf32>
    %29 = tpu.matmul %26, %28, %cst_27 {dimension_numbers = #tpu.dot_dimension_numbers<[1], [0], [0], [1], [0, 0, 1, 1], [], []>} : vector<8x4xf32>, vector<4x324xf32>, vector<8x324xf32> -> vector<8x324xf32>
    %30 = arith.addf %24, %29 : vector<8x324xf32>
    %c5 = arith.constant 5 : index
    %c0_28 = arith.constant 0 : index
    %c0_29 = arith.constant 0 : index
    %31 = vector.load %arg3[%c5, %c0_28, %c0_29] : memref<9x8x4xf32, #tpu.memory_space<vmem>>, vector<1x8x4xf32>
    %32 = vector.shape_cast %31 : vector<1x8x4xf32> to vector<8x4xf32>
    %c0_30 = arith.constant 0 : index
    %c0_31 = arith.constant 0 : index
    %c20 = arith.constant 20 : index
    %33 = vector.load %arg1[%c0_30, %c0_31, %c20] : memref<1x4x362xf32, #tpu.memory_space<vmem>>, vector<1x4x324xf32>
    %34 = vector.shape_cast %33 : vector<1x4x324xf32> to vector<4x324xf32>
    %cst_32 = arith.constant dense<0.000000e+00> : vector<8x324xf32>
    %35 = tpu.matmul %32, %34, %cst_32 {dimension_numbers = #tpu.dot_dimension_numbers<[1], [0], [0], [1], [0, 0, 1, 1], [], []>} : vector<8x4xf32>, vector<4x324xf32>, vector<8x324xf32> -> vector<8x324xf32>
    %36 = arith.addf %30, %35 : vector<8x324xf32>
    %c6 = arith.constant 6 : index
    %c0_33 = arith.constant 0 : index
    %c0_34 = arith.constant 0 : index
    %37 = vector.load %arg3[%c6, %c0_33, %c0_34] : memref<9x8x4xf32, #tpu.memory_space<vmem>>, vector<1x8x4xf32>
    %38 = vector.shape_cast %37 : vector<1x8x4xf32> to vector<8x4xf32>
    %c0_35 = arith.constant 0 : index
    %c0_36 = arith.constant 0 : index
    %c36 = arith.constant 36 : index
    %39 = vector.load %arg1[%c0_35, %c0_36, %c36] : memref<1x4x362xf32, #tpu.memory_space<vmem>>, vector<1x4x324xf32>
    %40 = vector.shape_cast %39 : vector<1x4x324xf32> to vector<4x324xf32>
    %cst_37 = arith.constant dense<0.000000e+00> : vector<8x324xf32>
    %41 = tpu.matmul %38, %40, %cst_37 {dimension_numbers = #tpu.dot_dimension_numbers<[1], [0], [0], [1], [0, 0, 1, 1], [], []>} : vector<8x4xf32>, vector<4x324xf32>, vector<8x324xf32> -> vector<8x324xf32>
    %42 = arith.addf %36, %41 : vector<8x324xf32>
    %c7 = arith.constant 7 : index
    %c0_38 = arith.constant 0 : index
    %c0_39 = arith.constant 0 : index
    %43 = vector.load %arg3[%c7, %c0_38, %c0_39] : memref<9x8x4xf32, #tpu.memory_space<vmem>>, vector<1x8x4xf32>
    %44 = vector.shape_cast %43 : vector<1x8x4xf32> to vector<8x4xf32>
    %c0_40 = arith.constant 0 : index
    %c0_41 = arith.constant 0 : index
    %c37 = arith.constant 37 : index
    %45 = vector.load %arg1[%c0_40, %c0_41, %c37] : memref<1x4x362xf32, #tpu.memory_space<vmem>>, vector<1x4x324xf32>
    %46 = vector.shape_cast %45 : vector<1x4x324xf32> to vector<4x324xf32>
    %cst_42 = arith.constant dense<0.000000e+00> : vector<8x324xf32>
    %47 = tpu.matmul %44, %46, %cst_42 {dimension_numbers = #tpu.dot_dimension_numbers<[1], [0], [0], [1], [0, 0, 1, 1], [], []>} : vector<8x4xf32>, vector<4x324xf32>, vector<8x324xf32> -> vector<8x324xf32>
    %48 = arith.addf %42, %47 : vector<8x324xf32>
    %c8 = arith.constant 8 : index
    %c0_43 = arith.constant 0 : index
    %c0_44 = arith.constant 0 : index
    %49 = vector.load %arg3[%c8, %c0_43, %c0_44] : memref<9x8x4xf32, #tpu.memory_space<vmem>>, vector<1x8x4xf32>
    %50 = vector.shape_cast %49 : vector<1x8x4xf32> to vector<8x4xf32>
    %c0_45 = arith.constant 0 : index
    %c0_46 = arith.constant 0 : index
    %c38 = arith.constant 38 : index
    %51 = vector.load %arg1[%c0_45, %c0_46, %c38] : memref<1x4x362xf32, #tpu.memory_space<vmem>>, vector<1x4x324xf32>
    %52 = vector.shape_cast %51 : vector<1x4x324xf32> to vector<4x324xf32>
    %cst_47 = arith.constant dense<0.000000e+00> : vector<8x324xf32>
    %53 = tpu.matmul %50, %52, %cst_47 {dimension_numbers = #tpu.dot_dimension_numbers<[1], [0], [0], [1], [0, 0, 1, 1], [], []>} : vector<8x4xf32>, vector<4x324xf32>, vector<8x324xf32> -> vector<8x324xf32>
    %54 = arith.addf %48, %53 : vector<8x324xf32>
    %c0_48 = arith.constant 0 : index
    %c0_49 = arith.constant 0 : index
    %55 = vector.load %arg4[%c0_48, %c0_49] : memref<8x1xf32, #tpu.memory_space<vmem>>, vector<8x1xf32>
    %56 = vector.broadcast %55 : vector<8x1xf32> to vector<8x324xf32>
    %57 = arith.addf %54, %56 : vector<8x324xf32>
    %cst_50 = arith.constant 0.000000e+00 : f32
    %58 = vector.broadcast %cst_50 : f32 to vector<8x324xf32>
    %59 = arith.maximumf %57, %58 : vector<8x324xf32>
    %c0_51 = arith.constant 0 : index
    %c0_52 = arith.constant 0 : index
    %c0_53 = arith.constant 0 : index
    %60 = vector.load %arg2[%c0_51, %c0_52, %c0_53] : memref<1x8x324xf32, #tpu.memory_space<vmem>>, vector<1x8x324xf32>
    %61 = vector.shape_cast %60 : vector<1x8x324xf32> to vector<8x324xf32>
    %62 = arith.mulf %61, %59 : vector<8x324xf32>
    %c0_54 = arith.constant 0 : index
    %c0_55 = arith.constant 0 : index
    %c0_56 = arith.constant 0 : index
    %63 = vector.load %arg5[%c0_54, %c0_55, %c0_56] : memref<1x8x324xf32, #tpu.memory_space<vmem>>, vector<1x8x324xf32>
    %64 = vector.shape_cast %63 : vector<1x8x324xf32> to vector<8x324xf32>
    %65 = vector.shape_cast %62 : vector<8x324xf32> to vector<1x8x324xf32>
    tpu.vector_store %arg5[%c0_54, %c0_55, %c0_56], %65 {strides = array<i32>} : memref<1x8x324xf32, #tpu.memory_space<vmem>>, vector<1x8x324xf32>,
    return
  }
  func.func @transform_0(%arg0: i32) -> (i32, i32, i32) {
    %c0_i32 = arith.constant 0 : i32
    %c0_i32_0 = arith.constant 0 : i32
    %c0_i32_1 = arith.constant 0 : i32
    return %arg0, %c0_i32, %c0_i32_0 : i32, i32, i32
  }
  func.func @transform_1(%arg0: i32) -> (i32, i32, i32) {
    %c0_i32 = arith.constant 0 : i32
    %c0_i32_0 = arith.constant 0 : i32
    %c0_i32_1 = arith.constant 0 : i32
    return %arg0, %c0_i32, %c0_i32_0 : i32, i32, i32
  }
  func.func @transform_2(%arg0: i32) -> (i32, i32, i32) {
    %c0_i32 = arith.constant 0 : i32
    %c0_i32_0 = arith.constant 0 : i32
    %c0_i32_1 = arith.constant 0 : i32
    %c0_i32_2 = arith.constant 0 : i32
    return %c0_i32, %c0_i32_0, %c0_i32_1 : i32, i32, i32
  }
  func.func @transform_3(%arg0: i32) -> (i32, i32) {
    %c0_i32 = arith.constant 0 : i32
    %c0_i32_0 = arith.constant 0 : i32
    %c0_i32_1 = arith.constant 0 : i32
    return %c0_i32, %c0_i32_0 : i32, i32
  }
  func.func @transform_4(%arg0: i32) -> (i32, i32, i32) {
    %c0_i32 = arith.constant 0 : i32
    %c0_i32_0 = arith.constant 0 : i32
    %c0_i32_1 = arith.constant 0 : i32
    return %arg0, %c0_i32, %c0_i32_0 : i32, i32, i32
  }
}

</mosaic_0001>

<bundles_post_ra>
// kernel: tpu_custom_call.1
= control target key start
LH: loop header
LB: loop body
LE: loop exit
PB: predicated region body
PF: predicated region fallthrough
CT: control target
= control target key end

     0   :  { %9 = vsyncpa [#allocation3], 0  ;;  %s2800_s0 = inlined_call_operand.hbm [shape: f32[2,4,362], index: 0, kind: input, shape index: {}]   ;;  %s2801_s1 = inlined_call_operand.hbm [shape: f32[2,8,324], index: 1, kind: input, shape index: {}]   ;;  %s2802_s2 = inlined_call_operand.hbm [shape: f32[9,8,4], index: 2, kind: input, shape index: {}]   ;;  %s2803_s3 = inlined_call_operand.hbm [shape: f32[8,1], index: 3, kind: input, shape index: {}]   ;;  %s2804_s4 = inlined_call_operand.hbm [shape: f32[2,8,324], index: 4, kind: output, shape index: {}]  }
   0x1   :  { %11 = vsyncpa [#allocation3 + $0x1], 0 }
   0x2   :  { %12 = vsyncpa [#allocation6], 0 }
   0x3   :  { %14 = vsyncpa [#allocation6 + $0x1], 0 }
   0x4   :  { %15 = vsyncpa [#allocation9], 0 }
   0x5   :  { %16 = vsyncpa [#allocation4], 0 }
   0x6   :  { %18 = vsyncpa [#allocation4 + $0x1], 0  ;;  %s2400_s15 = smov 0   ;;  %s2402_s16 = smov 0  }
   0x7   :  { %s2404_s17 = smov 0   ;;  %s2406_s18 = smov 0  }
   0x8 LB: > { %s2421_s19 = sadd.s32 4294967295, %s2355_s18   ;;  %s1930_s20 = sadd.s32 4294967294, %s2355_s18   ;;  %s2355_s18 = sphi %s2406_s18, %s2828_s18   ;;  %s2351_s17 = sphi %s2404_s17, %s2827_s17   ;;  %s2347_s16 = sphi %s2402_s16, %s2826_s16   ;;  %s2343_s15 = sphi %s2400_s15, %s2825_s15  }
   0x9   : > { %p44_p0 = scmp.ne.s32.totalorder %s2347_s16, %s2343_s15  ;;  %p2805_p1 = scmp.eq.s32.totalorder %s2421_s19, 0 }
   0xa   : > { %p142_p3 = scmp.eq.s32.totalorder %s1930_s20, 1  ;;  %p1931_p5 = scmp.ge.s32.totalorder %s2355_s18, 1 }
   0xb   : > { %p2430_p4 = por %p2805_p1, %p44_p0  ;;  %p149_p7 = scmp.lt.s32.totalorder %s2355_s18, 3 }
   0xc   : > { %p2435_p6 = por %p142_p3, %p44_p0  ;;  %s2357_s24 = smov [#allocation7]  }
   0xd   : > { %s2809_s21 = scalar_select %p2430_p4, 1, 0 }
   0xe   : > { %s2810_s22 = scalar_select %p2435_p6, 1, 0 }
   0xf   : > { %p2440_p8 = pnand %p1931_p5, %p149_p7  ;;  %s161_s25 = sshll.u32 %s2357_s24, 4  ;;  %s2444_s25 = int_to_ptr.vmem [resolvable:$true] %s161_s25 }
  0x10   : > { %s2358_s27 = smov [#allocation8]   ;;  %s2161_s5 = scalar_lea.hbm %s2802_s2, 1152 }
  0x11   : > { %s2811_s23 = scalar_select %p2440_p8, 1, 0 }
  0x12   : > { %p2088_p9 = pneg %p2440_p8  ;;  %s175_s28 = sshll.u32 %s2358_s27, 4  ;;  %s2455_s28 = int_to_ptr.vmem [resolvable:$true] %s175_s28 }
  0x13   : > { %p2162_p12 = scmp.ne.s32.totalorder %s2802_s2, %s2161_s5  ;;  %p2168_p5 = scmp.lt.u32.totalorder %s2161_s5, %s2802_s2 }
  0x14   : > { %p2451_p11 = pnand %p2088_p9, %p2805_p1 }
  0x16   : > { %p2163_p13 = pneg %p2451_p11 }
  0x18   : > { %p2164_p0 = pnand %p2163_p13, %p2162_p12 }
  0x1a   : > { %p2165_p3 = pneg %p2164_p0 }
  0x1c   : > { %p2170_p7 = pnand %p2168_p5, %p2165_p3 }
  0x1e   : > { %2173 = shalt.err (!%p2170_p7)
}
  0x1f   : > { %s2174_s10 = scalar_lea.vmem %s2444_s25, 1152  ;;  %p2182_p2 = scmp.lt.s32.totalorder %s2444_s25, %s2444_s25 }
  0x20   : > { %p2175_p9 = scmp.ne.s32.totalorder %s2444_s25, %s2174_s10  ;;  %p2183_p12 = scmp.lt.s32.totalorder %s2174_s10, %s2174_s10 }
  0x22   : > { %p2177_p10 = pnand %p2175_p9, %p2163_p13  ;;  %p2184_p0 = por %p2183_p12, %p2182_p2 }
  0x24   : > { %p2178_p1 = pneg %p2177_p10 }
  0x26   : > { %p2185_p6 = pnand %p2184_p0, %p2178_p1 }
  0x28   : > { %2188 = shalt.err (!%p2185_p6)
}
  0x29   : > { %s2359_s11 = smov 128   ;;  %s2360_s12 = smov 8  }
  0x2a   : > { %2091 = dma.hbm_to_vmem [thread:$0]  (!%p2451_p11), %s2802_s2, 1152, %s2444_s25, [#allocation6], %s2359_s11, %s2359_s11, %s2360_s12  }
  0x2b   : > { %s2189_s27 = scalar_lea.hbm %s2803_s3, 128 }
  0x2c   : > { %p2190_p2 = scmp.ne.s32.totalorder %s2803_s3, %s2189_s27  ;;  %p2196_p10 = scmp.lt.u32.totalorder %s2189_s27, %s2803_s3 }
  0x2e   : > { %p2192_p1 = pnand %p2190_p2, %p2163_p13 }
  0x30   : > { %p2193_p6 = pneg %p2192_p1 }
  0x32   : > { %p2198_p3 = pnand %p2196_p10, %p2193_p6 }
  0x34   : > { %2201 = shalt.err (!%p2198_p3)
}
  0x35   : > { %s2202_s25 = scalar_lea.vmem %s2455_s28, 128  ;;  %p2210_p12 = scmp.lt.s32.totalorder %s2455_s28, %s2455_s28 }
  0x36   : > { %p2203_p5 = scmp.ne.s32.totalorder %s2455_s28, %s2202_s25  ;;  %p2211_p0 = scmp.lt.s32.totalorder %s2202_s25, %s2202_s25 }
  0x38   : > { %p2205_p7 = pnand %p2203_p5, %p2163_p13  ;;  %p2212_p2 = por %p2211_p0, %p2210_p12 }
  0x3a   : > { %p2206_p9 = pneg %p2205_p7 }
  0x3c   : > { %p2213_p1 = pnand %p2212_p2, %p2206_p9 }
  0x3e   : > { %2216 = shalt.err (!%p2213_p1)
}
  0x3f   : > { %2094 = dma.hbm_to_vmem [thread:$0]  (!%p2451_p11), %s2803_s3, 128, %s2455_s28, [#allocation9]  }
  0x40   : > { %s2510_s9 = sadd.s32 1, %s2355_s18   ;;  %s31_s26 = sadd.s32 1, %s2351_s17 }
  0x41   : > { %s28_s10 = ssub.s32 %s2355_s18, %s2510_s9  ;;  %p38_p13 = scmp.ne.s32.totalorder %s2351_s17, %s2347_s16 }
  0x42   : > { %p29_p6 = scmp.eq.s32.totalorder %s28_s10, 0  ;;  %p39_p10 = scmp.eq.s32.totalorder %s2355_s18, 0 }
  0x43   : > { %p2813_p3 = scmp.eq.s32.totalorder %s2421_s19, 1  ;;  %p2108_p7 = scmp.lt.s32.totalorder %s2355_s18, 2 }
  0x44   : > { %s2526_s12 = scalar_select %p29_p6, %s2351_s17, %s31_s26  }
  0x45   : > { %p2520_p5 = por %p2813_p3, %p38_p13  ;;  %p40_p9 = por %p39_p10, %p38_p13 }
  0x46   : > { %s2529_s13 = sand.u32 1, %s2351_s17   ;;  %s2068_s14 = smul.u32 192, %s2355_s18 }
  0x47   : > { %s2814_s11 = scalar_select %p2520_p5, 1, 0 }
  0x48   : > { %s2067_s28 = smul.u32 12, %s2529_s13  ;;  %p2533_p11 = pnand %p2108_p7, %p40_p9 }
  0x49   : > { %s205_s24 = sand.u32 1, %s2355_s18   ;;  %s2541_s30 = scalar_lea.hbm %s2800_s0, %s2068_s14 }
  0x4a   : > { %s190_s5 = scalar_lea.vmem [#allocation2], %s2067_s28  ;;  %s187_s25 = scalar_lea.sflag [#allocation3], %s2529_s13 }
  0x4b   : > { %s198_s6 = sshll.u32 %s190_s5, 4  ;;  %s2217_s7 = scalar_lea.hbm %s2541_s30, 192  ;;  %s2543_s6 = int_to_ptr.vmem [resolvable:$true] %s198_s6 }
  0x4c   : > { %p2218_p12 = scmp.ne.s32.totalorder %s2541_s30, %s2217_s7  ;;  %p2219_p0 = pneg %p2533_p11 }
  0x4d   : > { %s2222_s10 = scalar_lea.hbm %s2800_s0, 384  ;;  %p2223_p13 = scmp.lt.u32.totalorder %s2541_s30, %s2800_s0 }
  0x4e   : > { %p2220_p2 = pnand %p2219_p0, %p2218_p12  ;;  %p2224_p6 = scmp.lt.u32.totalorder %s2222_s10, %s2217_s7 }
  0x4f   : > { %p2226_p3 = scmp.lt.u32.totalorder %s2217_s7, %s2541_s30 }
  0x50   : > { %p2221_p1 = pneg %p2220_p2  ;;  %p2225_p10 = por %p2224_p6, %p2223_p13 }
  0x52   : > { %p2227_p7 = por %p2226_p3, %p2225_p10 }
  0x54   : > { %p2228_p9 = pnand %p2227_p7, %p2221_p1 }
  0x56   : > { %2231 = shalt.err (!%p2228_p9)
}
  0x57   : > { %s2232_s28 = scalar_lea.vmem %s2543_s6, 192  ;;  %s2361_s29 = smov [#allocation2]  }
  0x58   : > { %p2233_p12 = scmp.ne.s32.totalorder %s2543_s6, %s2232_s28  ;;  %s2237_s5 = sshll.u32 %s2361_s29, 4  ;;  %s2238_s5 = int_to_ptr.vmem [resolvable:$false] %s2237_s5 }
  0x59   : > { %s2239_s8 = scalar_lea.vmem %s2238_s5, 384  ;;  %p2240_p4 = scmp.lt.s32.totalorder %s2543_s6, %s2238_s5 }
  0x5a   : > { %p2235_p2 = pnand %p2233_p12, %p2219_p0  ;;  %p2241_p13 = scmp.lt.s32.totalorder %s2239_s8, %s2232_s28 }
  0x5c   : > { %p2236_p5 = pneg %p2235_p2  ;;  %p2242_p6 = por %p2241_p13, %p2240_p4 }
  0x5e   : > { %p2243_p10 = pnand %p2242_p6, %p2236_p5 }
  0x60   : > { %2246 = shalt.err (!%p2243_p10)
}
  0x61   : > { %2098 = dma.hbm_to_vmem [thread:$0]  (!%p2533_p11), %s2541_s30, 192, %s2543_s6, %s187_s25  }
  0x62   : > { %s2069_s7 = smul.u32 24, %s2529_s13  ;;  %s206_s5 = scalar_lea.sflag [#allocation6], %s205_s24 }
  0x63   : > { %s2070_s26 = smul.u32 384, %s2355_s18  ;;  %s2252_s6 = scalar_lea.hbm %s2801_s1, 768 }
  0x64   : > { %s209_s28 = scalar_lea.vmem [#allocation5], %s2069_s7 }
  0x65   : > { %s2576_s27 = scalar_lea.hbm %s2801_s1, %s2070_s26  ;;  %s217_s29 = sshll.u32 %s209_s28, 4  ;;  %s218_s29 = int_to_ptr.vmem [resolvable:$true] %s217_s29 }
  0x66   : > { %s2247_s8 = scalar_lea.hbm %s2576_s27, 384  ;;  %p2253_p3 = scmp.lt.u32.totalorder %s2576_s27, %s2801_s1 }
  0x67   : > { %p2248_p4 = scmp.ne.s32.totalorder %s2576_s27, %s2247_s8  ;;  %p2254_p7 = scmp.lt.u32.totalorder %s2252_s6, %s2247_s8 }
  0x68   : > { %p2256_p12 = scmp.lt.u32.totalorder %s2247_s8, %s2576_s27 }
  0x69   : > { %p2250_p5 = pnand %p2248_p4, %p2219_p0  ;;  %p2255_p9 = por %p2254_p7, %p2253_p3 }
  0x6b   : > { %p2251_p1 = pneg %p2250_p5  ;;  %p2257_p2 = por %p2256_p12, %p2255_p9 }
  0x6d   : > { %p2258_p13 = pnand %p2257_p2, %p2251_p1 }
  0x6f   : > { %2261 = shalt.err (!%p2258_p13)
}
  0x70   : > { %s2262_s24 = scalar_lea.vmem %s218_s29, 384  ;;  %s2362_s7 = smov [#allocation5]  }
  0x71   : > { %p2263_p6 = scmp.ne.s32.totalorder %s218_s29, %s2262_s24  ;;  %s2267_s10 = sshll.u32 %s2362_s7, 4  ;;  %s2268_s10 = int_to_ptr.vmem [resolvable:$false] %s2267_s10 }
  0x72   : > { %s2269_s14 = scalar_lea.vmem %s2268_s10, 768  ;;  %p2270_p5 = scmp.lt.s32.totalorder %s218_s29, %s2268_s10 }
  0x73   : > { %p2265_p10 = pnand %p2263_p6, %p2219_p0  ;;  %p2271_p8 = scmp.lt.s32.totalorder %s2269_s14, %s2262_s24 }
  0x75   : > { %p2266_p4 = pneg %p2265_p10  ;;  %p2272_p3 = por %p2271_p8, %p2270_p5 }
  0x77   : > { %p2273_p7 = pnand %p2272_p3, %p2266_p4 }
  0x79   : > { %2276 = shalt.err (!%p2273_p7)
}
  0x7a   : > { %2101 = dma.hbm_to_vmem [thread:$0]  (!%p2533_p11), %s2576_s27, 384, %s218_s29, %s206_s5  }
  0x7b   : > { %p2816_p1 = scmp.ne.s32.totalorder %s2811_s23, 0 }
  0x7c   : > { %s2602_s28 = sand.u32 (!%p2816_p1), 1, %s2347_s16   ;;  %p2817_p8 = scmp.ne.s32.totalorder (!%p2816_p1), %s2809_s21, 0 }
  0x7d   : > { %226 = sbr.rel (%p2816_p1) target bundleno = 566 (0x236), region = 36  ;;  %s229_s13 = scalar_lea.sflag (!%p2816_p1), [#allocation3], %s2602_s28 }
  0x7e   : > { %s2071_s8 = smul.u32 (!%p2816_p1), 12, %s2602_s28 }
  0x80   : > { %s2606_s30 = scalar_lea.vmem (!%p2816_p1), [#allocation2], %s2071_s8 }
  0x84   : > { %2322 = dma.done.wait (%p2817_p8), %s229_s13, 192  }
  0x85   : > { %2324 = vsyncadd (%p2817_p8), %s229_s13, 4294967104  ;;  %s237_s23 = sand.u32 1, %s2421_s19   ;;  %s2072_s20 = smul.u32 24, %s2602_s28 }
  0x86   : > { %s238_s27 = scalar_lea.sflag [#allocation6], %s237_s23 }
  0x87   : > { %s2616_s29 = scalar_lea.vmem [#allocation5], %s2072_s20 }
  0x88   : > { %2326 = dma.done.wait (%p2817_p8), %s238_s27, 384  }
  0x89   : > { %2328 = vsyncadd (%p2817_p8), %s238_s27, 4294966912  ;;  %p2818_p11 = scmp.eq.s32.totalorder %s2421_s19, 0 }
  0x8b   : > { %2330 = dma.done.wait (%p2818_p11), [#allocation6], 1152   ;;  %p2819_p0 = pmov %p2818_p11 }
  0x8d   : > { %2332 = vsyncadd (%p2819_p0), [#allocation6], 4294966144  ;;  %p2820_p9 = pmov %p2819_p0 }
  0x8e   : > { %p2821_p12 = pmov %p2819_p0 }
  0x8f   : > { %2334 = dma.done.wait (%p2820_p9), [#allocation9], 128  }
  0x90   : > { %2336 = vsyncadd (%p2821_p12), [#allocation9], 4294967168  ;;  %v2363_v0 = vmov 0.0   ;;  %vm2364_vm0 = vmmov 0   ;;  %v2635_v1 = vld [vmem:[%s2606_s30] sm:$0xff]  ;;  %s2365_s21 = smov 127  }
  0x91   : > { %2006 = vmatprep.subr.mxu1 %v2363_v0  ;;  %371 = vmatprep.mubr.f32.mxu0 %v2363_v0  ;;  %v286_v2 = vcombine.high %v2635_v1, %v2635_v1  ;;  %v2641_v3 = vld [vmem:[%s2606_s30 + $0x8] sm:$0xf]  ;;  %s2366_s5 = smov 126   ;;  %s2367_s6 = smov 110   ;;  %v2373_v12 = vmov 0   ;;  %vm300_vm1 = vcmask 1043456  }
  0x92   : > { %2008 = vmatprep.mubr.msk.f32.mxu1 %vm2364_vm0, %v2363_v0  ;;  %287 = vrot.lane.b32.xlu1 %v2635_v1, %s2365_s21  ;;  %v601_v4 = vld [vmem:[%s2606_s30 + $0x8] sm:$0xf]  ;;  %s2368_s25 = smov 109   ;;  %s2369_s26 = smov 108   ;;  %vm293_vm2 = vcmask 1039360   ;;  %vm296_vm3 = vcmask 31744  }
  0x93   : > { %289 = vrot.lane.b32.xlu0 %v286_v2, %s2365_s21  ;;  %v770_v5 = vld [vmem:[%s2606_s30 + $0x8] sm:$0xf]  ;;  %s2370_s24 = smov 92   ;;  %s2371_s7 = smov 91   ;;  %vm611_vm4 = vcmask 1031168   ;;  %vm780_vm5 = vcmask 900096  }
  0x94   : > { %v939_v6 = vld [vmem:[%s2606_s30 + $0x8] sm:$0xf]  ;;  %s2372_s10 = smov 90   ;;  %2159 = vset.pattern.permute.xlu0 %v2373_v12  ;;  %v599_v29 = vld [vmem:[#allocation7 + $0x10] sm:$0xff]  ;;  %v768_v31 = vld [vmem:[#allocation7 + $0x18] sm:$0xff]  ;;  %vm949_vm6 = vcmask 891904  }
  0x95   : > { %v1108_v7 = vld [vmem:[%s2606_s30 + $0x8] sm:$0xf]  ;;  %vm1118_vm7 = vcmask 883712   ;;  %v1275_v46 = vld [vmem:[#allocation7 + $0x30] sm:$0xff]  ;;  %vm1287_vm8 = vcmask 752640   ;;  %v1444_v49 = vld [vmem:[#allocation7 + $0x38] sm:$0xff] }
  0x96   : > { %607 = vrot.lane.b32.xlu1 %v286_v2, %s2366_s5  ;;  %v1277_v8 = vld [vmem:[%s2606_s30 + $0x8] sm:$0xf]  ;;  %vm1456_vm9 = vcmask 744448   ;;  %vm1625_vm10 = vcmask 736256   ;;  %vm1801_vm11 = vcmask 556032   ;;  %s278_s14 = scalar_lea.vmem [#allocation10], %s2072_s20 }
  0x97   : > { %291 = vrot.lane.b32.xlu0 %v2641_v3, %s2365_s21  ;;  %v1446_v9 = vld [vmem:[%s2606_s30 + $0x8] sm:$0xf]  ;;  %s2073_s8 = smul.u32 384, %s2421_s19  ;;  %s1818_s13 = sshll.u32 %s278_s14, 4  ;;  %s2758_s13 = int_to_ptr.vmem [resolvable:$true] %s1818_s13 }
  0x98   : > { %v1615_v10 = vld [vmem:[%s2606_s30 + $0x8] sm:$0xf]  ;;  %s1804_s20 = scalar_lea.sflag [#allocation4], %s2602_s28  ;;  %s2277_s19 = scalar_lea.vmem %s2758_s13, 384 }
  0x99   : > { %v1781_v11 = vld [vmem:[#allocation8] sm:$0xff]  ;;  %v279_v24 = vld [vmem:[#allocation7] sm:$0xff]  ;;  %s2756_s27 = scalar_lea.hbm %s2804_s4, %s2073_s8  ;;  %p2278_p2 = scmp.ne.s32.totalorder %s2758_s13, %s2277_s19 }
  0x9a   : > { %605 = vrot.lane.b32.xlu1 %v2635_v1, %s2366_s5  ;;  %v283_v18 = vld [vmem:[#allocation7 + $0x8] sm:$0xff]  ;;  %v937_v34 = vld [vmem:[#allocation7 + $0x20] sm:$0xff]  ;;  %p2822_p13 = scmp.ne.s32.totalorder %s2814_s11, 0 }
  0x9b   : > { %609 = vrot.lane.b32.xlu0 %v601_v4, %s2366_s5  ;;  %v1106_v39 = vld [vmem:[#allocation7 + $0x28] sm:$0xff]  ;;  %v1613_v53 = vld [vmem:[#allocation7 + $0x40] sm:$0xff] }
  0x9c   : > { %p2279_p6 = pnand %p2278_p2, %p2822_p13 }
  0x9e   : > { %778 = vrot.lane.b32.xlu1 %v770_v5, %s2367_s6  ;;  %p2280_p10 = pneg %p2279_p6 }
  0x9f   : > { %776 = vrot.lane.b32.xlu0 %v286_v2, %s2367_s6 }
  0xa2   : > { %945 = vrot.lane.b32.xlu1 %v286_v2, %s2368_s25 }
  0xa3   : > { %774 = vrot.lane.b32.xlu0 %v2635_v1, %s2367_s6 }
  0xa6   : > { %943 = vrot.lane.b32.xlu1 %v2635_v1, %s2368_s25 }
  0xa7   : > { %947 = vrot.lane.b32.xlu0 %v939_v6, %s2368_s25 }
  0xaa   : > { %1116 = vrot.lane.b32.xlu1 %v1108_v7, %s2369_s26 }
  0xab   : > { %1114 = vrot.lane.b32.xlu0 %v286_v2, %s2369_s26 }
  0xae   : > { %1283 = vrot.lane.b32.xlu1 %v286_v2, %s2370_s24 }
  0xaf   : > { %1112 = vrot.lane.b32.xlu0 %v2635_v1, %s2369_s26 }
  0xb2   : > { %1281 = vrot.lane.b32.xlu1 %v2635_v1, %s2370_s24 }
  0xb3   : > { %1285 = vrot.lane.b32.xlu0 %v1277_v8, %s2370_s24 }
  0xb6   : > { %1454 = vrot.lane.b32.xlu1 %v1446_v9, %s2371_s7 }
  0xb7   : > { %1452 = vrot.lane.b32.xlu0 %v286_v2, %s2371_s7 }
  0xba   : > { %1621 = vrot.lane.b32.xlu1 %v286_v2, %s2372_s10 }
  0xbb   : > { %1450 = vrot.lane.b32.xlu0 %v2635_v1, %s2371_s7 }
  0xbe   : > { %1619 = vrot.lane.b32.xlu1 %v2635_v1, %s2372_s10 }
  0xbf   : > { %1623 = vrot.lane.b32.xlu0 %v1615_v10, %s2372_s10 }
  0xc3   : > { %1784 = vperm.xlu0 %2159, %v1781_v11  }
 0x104   : > { %v288_v13 = vpop.permute.xlu1 %287 }
 0x105   : > { %v290_v14 = vpop.permute.xlu0 %289 }
 0x106   : > { %v294_v19 = vsel %vm293_vm2, %v288_v13, %v290_v14 }
 0x108   : > { %v608_v15 = vpop.permute.xlu1 %607 }
 0x109   : > { %v292_v16 = vpop.permute.xlu0 %291 }
 0x10a   : > { %2007 = vmatpush3.msk.msra.mxu1 %vm300_vm1, %v292_v16  ;;  %v295_v17 = vsel %vm293_vm2, %v290_v14, %v292_v16 }
 0x10b   : > { %1940 = vmatprep.subr.msk.mxu0 %vm300_vm1, %v295_v17  ;;  %2009 = vmatmul.mubr.msk.f32.vlgmr.msra.gmra.mrb[0].mxu1 %vm296_vm3, %v283_v18 }
 0x10c   : > { %v606_v20 = vpop.permute.xlu1 %605  ;;  %1941 = vmatpush1.msk.msra.mxu0 %vm300_vm1, %v294_v19  ;;  %2011 = vmatprep.subr.mxu1 %v2363_v0 }
 0x10d   : > { %1942 = vmatmul.mubr.msk.f32.vlgmr.msra.gmra.mrb[0].mxu0 %vm296_vm3, %v283_v18  ;;  %1945 = vmatprep.subr.msk.mxu0 %vm300_vm1, %v286_v2  ;;  %v610_v21 = vpop.permute.xlu0 %609  ;;  %v612_v26 = vsel %vm611_vm4, %v606_v20, %v608_v15 }
 0x10e   : > { %1946 = vmatpush1.msk.msra.mxu0 %vm300_vm1, %v2635_v1  ;;  %v613_v22 = vsel %vm611_vm4, %v608_v15, %v610_v21  ;;  %2012 = vmatpush3.msk.msra.mxu1 %vm300_vm1, %v2641_v3 }
 0x10f   : > { %1950 = vmatprep.subr.msk.mxu0 %vm300_vm1, %v613_v22  ;;  %2013 = vmatprep.mubr.msk.f32.mxu1 %vm2364_vm0, %v2363_v0 }
 0x110   : > { %v779_v23 = vpop.permute.xlu1 %778  ;;  %2016 = vmatprep.subr.mxu1 %v2363_v0  ;;  %521 = vmatprep.mubr.f32.mxu0 %v2363_v0 }
 0x111   : > { %v777_v25 = vpop.permute.xlu0 %776  ;;  %2014 = vmatmul.mubr.msk.f32.vlgmr.msra.gmra.mrb[2].mxu1 %vm296_vm3, %v279_v24 }
 0x112   : > { %2017 = vmatpush3.msk.msra.mxu1 %vm300_vm1, %v610_v21  ;;  %2018 = vmatprep.mubr.msk.f32.mxu1 %vm2364_vm0, %v2363_v0  ;;  %v782_v28 = vsel %vm780_vm5, %v777_v25, %v779_v23 }
 0x113   : > { %2021 = vmatprep.subr.mxu1 %v2363_v0 }
 0x114   : > { %v946_v27 = vpop.permute.xlu1 %945 }
 0x115   : > { %1947 = vmatmul.mubr.msk.f32.vlgmr.msra.gmra.mrb[0].mxu0 %vm296_vm3, %v279_v24  ;;  %v775_v30 = vpop.permute.xlu0 %774  ;;  %2019 = vmatmul.mubr.msk.f32.vlgmr.msra.gmra.mrb[4].mxu1 %vm296_vm3, %v599_v29 }
 0x116   : > { %1951 = vmatpush1.msk.msra.mxu0 %vm300_vm1, %v612_v26  ;;  %687 = vmatprep.mubr.f32.mxu0 %v2363_v0  ;;  %v781_v35 = vsel %vm780_vm5, %v775_v30, %v777_v25  ;;  %v1795_v26 = vld [vmem:[%s2616_s29 + $0x10] sm:$0xff] }
 0x117   : > { %1955 = vmatprep.subr.msk.mxu0 %vm300_vm1, %v782_v28  ;;  %2022 = vmatpush3.msk.msra.mxu1 %vm300_vm1, %v779_v23 }
 0x118   : > { %v944_v32 = vpop.permute.xlu1 %943  ;;  %2023 = vmatprep.mubr.msk.f32.mxu1 %vm2364_vm0, %v2363_v0  ;;  %2026 = vmatprep.subr.mxu1 %v2363_v0 }
 0x119   : > { %v948_v33 = vpop.permute.xlu0 %947  ;;  %2024 = vmatmul.mubr.msk.f32.vlgmr.msra.gmra.mrb[6].mxu1 %vm296_vm3, %v768_v31  ;;  %v950_v42 = vsel %vm949_vm6, %v944_v32, %v946_v27  ;;  %v1793_v32 = vld [vmem:[%s2616_s29] sm:$0xff] }
 0x11a   : > { %2027 = vmatpush3.msk.msra.mxu1 %vm300_vm1, %v948_v33  ;;  %2028 = vmatprep.mubr.msk.f32.mxu1 %vm2364_vm0, %v2363_v0  ;;  %v951_v37 = vsel %vm949_vm6, %v946_v27, %v948_v33 }
 0x11b   : > { %2031 = vmatprep.subr.mxu1 %v2363_v0 }
 0x11c   : > { %v1117_v36 = vpop.permute.xlu1 %1116 }
 0x11d   : > { %1952 = vmatmul.mubr.msk.f32.vlgmr.msra.gmra.mrb[0].mxu0 %vm296_vm3, %v599_v29  ;;  %v1115_v38 = vpop.permute.xlu0 %1114  ;;  %2029 = vmatmul.mubr.msk.f32.vlgmr.msra.gmra.mrb[8].mxu1 %vm296_vm3, %v937_v34 }
 0x11e   : > { %1956 = vmatpush1.msk.msra.mxu0 %vm300_vm1, %v781_v35  ;;  %856 = vmatprep.mubr.f32.mxu0 %v2363_v0  ;;  %v1120_v44 = vsel %vm1118_vm7, %v1115_v38, %v1117_v36  ;;  %v1794_v35 = vld [vmem:[%s2616_s29 + $0x8] sm:$0xff]  ;;  %s2374_s29 = smov [#allocation10]  }
 0x11f   : > { %1960 = vmatprep.subr.msk.mxu0 %vm300_vm1, %v951_v37  ;;  %2032 = vmatpush3.msk.msra.mxu1 %vm300_vm1, %v1117_v36  ;;  %s2281_s21 = sshll.u32 %s2374_s29, 4  ;;  %s2282_s21 = int_to_ptr.vmem [resolvable:$false] %s2281_s21 }
 0x120   : > { %v1284_v40 = vpop.permute.xlu1 %1283  ;;  %2033 = vmatprep.mubr.msk.f32.mxu1 %vm2364_vm0, %v2363_v0  ;;  %2036 = vmatprep.subr.mxu1 %v2363_v0  ;;  %s2283_s5 = scalar_lea.vmem %s2282_s21, 768  ;;  %p2284_p4 = scmp.lt.s32.totalorder %s2758_s13, %s2282_s21 }
 0x121   : > { %v1113_v41 = vpop.permute.xlu0 %1112  ;;  %2034 = vmatmul.mubr.msk.f32.vlgmr.msra.gmra.mrb[10].mxu1 %vm296_vm3, %v1106_v39  ;;  %p2285_p5 = scmp.lt.s32.totalorder %s2283_s5, %s2277_s19 }
 0x122   : > { %2038 = vmatprep.mubr.msk.f32.mxu1 %vm2364_vm0, %v2363_v0  ;;  %v1119_v50 = vsel %vm1118_vm7, %v1113_v41, %v1115_v38 }
 0x123   : > { %p2286_p3 = por %p2285_p5, %p2284_p4 }
 0x124   : > { %v1282_v43 = vpop.permute.xlu1 %1281 }
 0x125   : > { %1957 = vmatmul.mubr.msk.f32.vlgmr.msra.gmra.mrb[0].mxu0 %vm296_vm3, %v768_v31  ;;  %v1286_v45 = vpop.permute.xlu0 %1285  ;;  %v1288_v55 = vsel %vm1287_vm8, %v1282_v43, %v1284_v40  ;;  %p2287_p7 = pnand %p2286_p3, %p2280_p10 }
 0x126   : > { %1961 = vmatpush1.msk.msra.mxu0 %vm300_vm1, %v950_v42  ;;  %1025 = vmatprep.mubr.f32.mxu0 %v2363_v0  ;;  %v1289_v51 = vsel %vm1287_vm8, %v1284_v40, %v1286_v45 }
 0x127   : > { %1965 = vmatprep.subr.msk.mxu0 %vm300_vm1, %v1120_v44  ;;  %2037 = vmatpush3.msk.msra.mxu1 %vm300_vm1, %v1286_v45 }
 0x128   : > { %v1455_v47 = vpop.permute.xlu1 %1454  ;;  %2039 = vmatmul.mubr.msk.f32.vlgmr.msra.gmra.mrb[12].mxu1 %vm296_vm3, %v1275_v46  ;;  %2041 = vmatprep.subr.mxu1 %v2363_v0 }
 0x129   : > { %v1453_v48 = vpop.permute.xlu0 %1452  ;;  %2042 = vmatpush3.msk.msra.mxu1 %vm300_vm1, %v1455_v47  ;;  %2043 = vmatprep.mubr.msk.f32.mxu1 %vm2364_vm0, %v2363_v0 }
 0x12a   : > { %2046 = vmatprep.subr.mxu1 %v2363_v0  ;;  %v1458_v56 = vsel %vm1456_vm9, %v1453_v48, %v1455_v47 }
 0x12c   : > { %2044 = vmatmul.mubr.msk.f32.vlgmr.msra.gmra.mrb[14].mxu1 %vm296_vm3, %v1444_v49  ;;  %v1622_v57 = vpop.permute.xlu1 %1621 }
 0x12d   : > { %1962 = vmatmul.mubr.msk.f32.vlgmr.msra.gmra.mrb[0].mxu0 %vm296_vm3, %v937_v34  ;;  %v1451_v52 = vpop.permute.xlu0 %1450  ;;  %2048 = vmatprep.mubr.msk.f32.mxu1 %vm2364_vm0, %v2363_v0 }
 0x12e   : > { %1966 = vmatpush1.msk.msra.mxu0 %vm300_vm1, %v1119_v50  ;;  %1194 = vmatprep.mubr.f32.mxu0 %v2363_v0  ;;  %v1457_v58 = vsel %vm1456_vm9, %v1451_v52, %v1453_v48 }
 0x12f   : > { %1970 = vmatprep.subr.msk.mxu0 %vm300_vm1, %v1289_v51 }
 0x130   : > { %v1620_v60 = vpop.permute.xlu1 %1619 }
 0x131   : > { %v1624_v54 = vpop.permute.xlu0 %1623  ;;  %v1626_v61 = vsel %vm1625_vm10, %v1620_v60, %v1622_v57 }
 0x132   : > { %2047 = vmatpush3.msk.msra.mxu1 %vm300_vm1, %v1624_v54  ;;  %v1627_v59 = vsel %vm1625_vm10, %v1622_v57, %v1624_v54 }
 0x133   : > { %2049 = vmatmul.mubr.msk.f32.vlgmr.msra.gmra.mrb[16].mxu1 %vm296_vm3, %v1613_v53 }
 0x135   : > { %1967 = vmatmul.mubr.msk.f32.vlgmr.msra.gmra.mrb[0].mxu0 %vm296_vm3, %v1106_v39 }
 0x136   : > { %1971 = vmatpush1.msk.msra.mxu0 %vm300_vm1, %v1288_v55  ;;  %1363 = vmatprep.mubr.f32.mxu0 %v2363_v0 }
 0x137   : > { %1975 = vmatprep.subr.msk.mxu0 %vm300_vm1, %v1458_v56 }
 0x13d   : > { %1972 = vmatmul.mubr.msk.f32.vlgmr.msra.gmra.mrb[0].mxu0 %vm296_vm3, %v1275_v46 }
 0x13e   : > { %1976 = vmatpush1.msk.msra.mxu0 %vm300_vm1, %v1457_v58  ;;  %1532 = vmatprep.mubr.f32.mxu0 %v2363_v0 }
 0x13f   : > { %1980 = vmatprep.subr.msk.mxu0 %vm300_vm1, %v1627_v59 }
 0x142   : > { %v1785_v22 = vpop.permute.xlu0 %1784 }
 0x145   : > { %1977 = vmatmul.mubr.msk.f32.vlgmr.msra.gmra.mrb[0].mxu0 %vm296_vm3, %v1444_v49 }
 0x146   : > { %1981 = vmatpush1.msk.msra.mxu0 %vm300_vm1, %v1626_v61  ;;  %1701 = vmatprep.mubr.f32.mxu0 %v2363_v0 }
 0x14d   : > { %1982 = vmatmul.mubr.msk.f32.vlgmr.msra.gmra.mrb[0].mxu0 %vm296_vm3, %v1613_v53 }
 0x1de   : > { %v444_v62 = vpop.f32.mrb[0].mxu1 }
 0x1df   : > { %v2010_v63 = vpop.f32.mrb[1].mxu1 }
 0x1e4   : > { %v594_v1 = vpop.f32.mrb[2].mxu1 }
 0x1e5   : > { %v595_v2 = vadd.f32 %v594_v1, %v444_v62  ;;  %v2015_v3 = vpop.f32.mrb[3].mxu1 }
 0x1e8   : > { %v760_v4 = vpop.f32.mrb[4].mxu1 }
 0x1e9   : > { %v766_v5 = vadd.f32 %v760_v4, %v595_v2  ;;  %v2020_v6 = vpop.f32.mrb[5].mxu1 }
 0x1ec   : > { %v929_v7 = vpop.f32.mrb[6].mxu1 }
 0x1ed   : > { %v935_v8 = vadd.f32 %v929_v7, %v766_v5  ;;  %v2025_v9 = vpop.f32.mrb[7].mxu1 }
 0x1f0   : > { %v1098_v10 = vpop.f32.mrb[8].mxu1 }
 0x1f1   : > { %v1104_v11 = vadd.f32 %v1098_v10, %v935_v8  ;;  %v2030_v12 = vpop.f32.mrb[9].mxu1 }
 0x1f4   : > { %v1267_v13 = vpop.f32.mrb[10].mxu1 }
 0x1f5   : > { %v1273_v14 = vadd.f32 %v1267_v13, %v1104_v11  ;;  %v2035_v0 = vpop.f32.mrb[11].mxu1 }
 0x1fb   : > { %v1436_v15 = vpop.f32.mrb[12].mxu1 }
 0x1fc   : > { %v1442_v16 = vadd.f32 %v1436_v15, %v1273_v14  ;;  %v2040_v17 = vpop.f32.mrb[13].mxu1 }
 0x1ff   : > { %v1605_v18 = vpop.f32.mrb[14].mxu1 }
 0x200   : > { %v1611_v19 = vadd.f32 %v1605_v18, %v1442_v16  ;;  %v2045_v20 = vpop.f32.mrb[15].mxu1 }
 0x206   : > { %v1774_v21 = vpop.f32.mrb[16].mxu1 }
 0x207   : > { %v1780_v23 = vadd.f32 %v1774_v21, %v1611_v19  ;;  %v2050_v24 = vpop.f32.mrb[17].mxu1 }
 0x209   : > { %v1789_v25 = vadd.f32 %v1785_v22, %v1780_v23 }
 0x20b   : > { %v1792_v27 = vmax.f32 %v1789_v25, 0.0 }
 0x20d   : > { %v1798_v28 = vmul.f32 %v1795_v26, %v1792_v27 }
 0x20f   : > { %1802 = vst.msk [vmem:[%s278_s14 + $0x10] sm:$0xff] %vm1801_vm11, %v1798_v28 }
 0x220   : > { %v1703_v29 = vpop.f32.mrb[0].mxu0 }
 0x221   : > { %v1787_v30 = vadd.f32 %v1785_v22, %v1703_v29  ;;  %v1705_v31 = vpop.f32.mrb[1].mxu0 }
 0x222   : > { %v1788_v33 = vadd.f32 %v1785_v22, %v1705_v31 }
 0x223   : > { %v1790_v34 = vmax.f32 %v1787_v30, 0.0 }
 0x224   : > { %v1791_v36 = vmax.f32 %v1788_v33, 0.0 }
 0x225   : > { %v1796_v37 = vmul.f32 %v1793_v32, %v1790_v34 }
 0x226   : > { %v1797_v38 = vmul.f32 %v1794_v35, %v1791_v36 }
 0x227   : > { %1799 = vst [vmem:[%s278_s14] sm:$0xff] %v1796_v37 }
 0x228   : > { %1800 = vst [vmem:[%s278_s14 + $0x8] sm:$0xff] %v1797_v38 }
 0x229   : > { %2290 = shalt.err (!%p2287_p7)
}
 0x22a   : > { %s2291_s28 = scalar_lea.hbm %s2756_s27, 384  ;;  %s2295_s26 = scalar_lea.hbm %s2804_s4, 768 }
 0x22b   : > { %p2292_p1 = scmp.ne.s32.totalorder %s2756_s27, %s2291_s28  ;;  %p2296_p0 = scmp.lt.u32.totalorder %s2756_s27, %s2804_s4 }
 0x22c   : > { %p2297_p9 = scmp.lt.u32.totalorder %s2295_s26, %s2291_s28  ;;  %p2299_p2 = scmp.lt.u32.totalorder %s2291_s28, %s2756_s27 }
 0x22d   : > { %p2293_p8 = pnand %p2292_p1, %p2822_p13 }
 0x22e   : > { %p2298_p12 = por %p2297_p9, %p2296_p0 }
 0x22f   : > { %p2294_p11 = pneg %p2293_p8 }
 0x230   : > { %p2300_p6 = por %p2299_p2, %p2298_p12 }
 0x232   : > { %p2301_p10 = pnand %p2300_p6, %p2294_p11 }
 0x234   : > { %2304 = shalt.err (!%p2301_p10)
}
 0x235   : > { %2086 = dma.vmem_to_hbm [thread:$0]  (%p2822_p13), %s2758_s13, 384, %s2756_s27, %s1804_s20  }
 0x236 PF: > { %s1830_s10 = sand.u32 1, %s2343_s15   ;;  %p2823_p4 = scmp.ne.s32.totalorder %s2810_s22, 0 }
 0x237   : > { %p2824_p5 = scmp.ge.s32.totalorder %s2355_s18, 2  ;;  %s1831_s14 = scalar_lea.sflag [#allocation4], %s1830_s10 }
 0x239   : > { %p2103_p3 = pnand %p2824_p5, %p2823_p4 }
 0x23b   : > { %2338 = dma.done.wait (!%p2103_p3), %s1831_s14, 384  }
 0x23c   : > { %2340 = vsyncadd (!%p2103_p3), %s1831_s14, 4294966912  ;;  %p21_p7 = scmp.ge.s32.totalorder %s2510_s9, 4   ;;  %s2825_s15 = smov %s2347_s16 }
 0x23d   : > { %s2826_s16 = smov %s2351_s17  ;;  %s2827_s17 = smov %s2526_s12 }
 0x23e   : > { %s2828_s18 = smov %s2510_s9  ;;  %23 = sbr.rel (!%p21_p7) target bundleno = 8 (0x8), region = 110 }
 0x245   :  { %1836 = vsyncpa [#allocation3], 1 }
 0x246   :  { %1838 = vsyncpa [#allocation3 + $0x1], 1 }
 0x247   :  { %1839 = vsyncpa [#allocation6], 1 }
 0x248   :  { %1841 = vsyncpa [#allocation6 + $0x1], 1 }
 0x249   :  { %1842 = vsyncpa [#allocation9], 1 }
 0x24a   :  { %1843 = vsyncpa [#allocation4], 1 }
 0x24b   :  { %1845 = vsyncpa [#allocation4 + $0x1], 1 }

</bundles_post_ra>
